<compile_context>
chip_gen: v7x
topology: tpu7x:2x2x1
jax: 0.10.0
libtpu: 0.0.40
codegen_flags: <defaults>
</compile_context>

<pallas_src>
import functools

import jax
import jax.numpy as jnp
from jax.experimental import pallas as pl
from jax.experimental.pallas import tpu as pltpu

WEIGHT_BW = 8   # weight_bw argument of QcQuantizeWrapper
ACT_BW = 8      # activation_bw argument of QcQuantizeWrapper
ACT_NUM_STEPS = float(2.0 ** ACT_BW - 1.0)


# ----------------------------------------------------------------------------
# Generation-specific tiling (perf review: v6e wants 1024-wide tiles, v5e is
# already at its roofline knee at 512 and prefers a smaller tk, v7x has only
# 64 MiB VMEM so it keeps 512 tiles).  Falls back to safe defaults on non-TPU
# backends (e.g. the CPU interpret harness).
# ----------------------------------------------------------------------------
def _select_tile_targets():
    try:
        kind = jax.devices()[0].device_kind.lower()
    except Exception:
        kind = ""
    if "v6" in kind:
        return 1024, 1024, 1024, 64 << 20          # ~20 MiB footprint
    if "v5 lite" in kind or "v5e" in kind or "v5litepod" in kind:
        return 512, 512, 512, 64 << 20
    return 512, 512, 1024, 32 << 20                 # v7x & default


TM_TARGET, TN_TARGET, TK_TARGET, VMEM_LIMIT_BYTES = _select_tile_targets()


# ----------------------------------------------------------------------------
# Shared quantization math (kernels, param prep and reference).
# ----------------------------------------------------------------------------
def _round_up(x, m):
    return ((x + m - 1) // m) * m


def _tile_and_pad(dim, target, align):
    """Pick a tile size (multiple of `align`, <= target) and the padded dim."""
    tile = target if dim >= target else _round_up(dim, align)
    return tile, _round_up(dim, tile)


def _round_half_away(x):
    # AIMET 'nearest' rounding is round-half-away-from-zero (std::round),
    # not jnp.round's half-to-even.
    return jnp.where(x >= 0, jnp.floor(x + 0.5), jnp.ceil(x - 0.5))


def _compute_encoding(t_min, t_max, bw):
    """post_training_tf per-tensor encoding; the range always contains zero."""
    num_steps = float(2.0 ** bw - 1.0)
    t_min = jnp.minimum(t_min.astype(jnp.float32), 0.0)
    t_max = jnp.maximum(t_max.astype(jnp.float32), 0.0)
    scale = jnp.maximum((t_max - t_min) / num_steps, jnp.float32(1e-12))
    inv_scale = 1.0 / scale          # scalar; the kernel only ever multiplies
    zero_point = _round_half_away(-t_min * inv_scale)
    return inv_scale, scale, zero_point


def _apply_fake_quant(t, inv_scale, scale, zero_point, num_steps):
    q = jnp.clip(_round_half_away(t * inv_scale) + zero_point, 0.0, num_steps)
    return (q - zero_point) * scale


def _fake_quant_static(t, bw):
    """Full-tensor fake-quant (constant params / reference only)."""
    inv_s, s, zp = _compute_encoding(jnp.min(t), jnp.max(t), bw)
    return _apply_fake_quant(t, inv_s, s, zp, float(2.0 ** bw - 1.0))


# ----------------------------------------------------------------------------
# Pallas kernels
# ----------------------------------------------------------------------------
def _matmul_bias_kernel(x_ref, w_ref, b_ref, y_ref, mn_ref, mx_ref, acc_ref, *,
                        m_valid, tile_m, apply_row_mask):
    """Tiled Linear: y = x @ w + b (bf16 MXU, f32 acc) + fused tile min/max."""
    # IMPORTANT: program_id / num_programs are read only at the top level of
    # the kernel (never inside pl.when bodies) -- see header comment.
    k = pl.program_id(2)
    last_k = pl.num_programs(2) - 1
    row_base = pl.program_id(0) * tile_m

    @pl.when(k == 0)
    def _init():
        # Fold the bias into the accumulator init (saves an add at finalize).
        acc_ref[...] = jnp.broadcast_to(b_ref[...], acc_ref.shape)

    acc_ref[...] += jnp.dot(x_ref[...], w_ref[...],
                            preferred_element_type=jnp.float32)

    @pl.when(k == last_k)
    def _finalize():
        y = acc_ref[...]
        if apply_row_mask:
            # Rows that only exist due to M padding would contain the bias;
            # zero them so they cannot pollute the output quantizer's min/max
            # (the encoding range always includes zero, so zeros are neutral).
            row = row_base + jax.lax.broadcasted_iota(jnp.int32, y.shape, 0)
            y = jnp.where(row < m_valid, y, 0.0)
        y_ref[...] = y.astype(y_ref.dtype)
        # Fused per-tile min/max -> SMEM scalars.  Removes an entire HBM
        # re-read of the (m_pad, n_pad) f32 intermediate for the encoding.
        mn_ref[0, 0] = jnp.min(y)
        mx_ref[0, 0] = jnp.max(y)


def _output_fakequant_kernel(enc_ref, y_ref, o_ref, *, num_steps):
    """Elementwise quantize-dequantize with global encodings read from SMEM."""
    inv_scale = enc_ref[0]
    scale = enc_ref[1]
    zero_point = enc_ref[2]
    o_ref[...] = _apply_fake_quant(y_ref[...], inv_scale, scale,
                                   zero_point, num_steps).astype(o_ref.dtype)


# ----------------------------------------------------------------------------
# Wrapper
# ----------------------------------------------------------------------------
def prepare_qc_linear_params(weight, bias):
    """One-time parameter prep (cache across forward calls).

    Fake-quantizes weight/bias with their static full-tensor encodings,
    pre-transposes W from PyTorch (C_out, C_in) to (C_in, C_out) so C_out maps
    to TPU lanes, casts the matmul operand to bf16 and zero-pads both to
    lane/tile-aligned shapes.
    """
    c_out, c_in = weight.shape
    _, k_pad = _tile_and_pad(c_in, TK_TARGET, 128)
    _, n_pad = _tile_and_pad(c_out, TN_TARGET, 128)

    w_dq = _fake_quant_static(weight.astype(jnp.float32), WEIGHT_BW)
    b_dq = _fake_quant_static(bias.astype(jnp.float32), WEIGHT_BW)

    w_prep = jnp.pad(jnp.transpose(w_dq),
                     ((0, k_pad - c_in), (0, n_pad - c_out))).astype(jnp.bfloat16)
    b_prep = jnp.pad(b_dq, (0, n_pad - c_out)).reshape(1, n_pad).astype(jnp.float32)
    return w_prep, b_prep


def _pass2_tiles(m_pad, n_pad, tm, tn):
    # Wider lane-dense blocks for the streaming quant-dequant pass (amortizes
    # per-grid-step overhead); keep the block under ~4 MiB of VMEM.  tm2 == tm
    # guarantees no fully out-of-bounds output block for the unpadded output.
    tn2 = n_pad if (n_pad <= 2048 and tm * n_pad * 4 <= (4 << 20)) else tn
    return tm, tn2


@functools.partial(jax.jit, static_argnames=("c_out",))
def qc_quantize_wrapper_forward(x, w_prep, b_prep, *, c_out):
    b, s, c_in = x.shape
    m = b * s
    k_pad, n_pad = w_prep.shape

    # 16-row alignment: bf16 packs 16 rows per vreg sublane group.
    tm, m_pad = _tile_and_pad(m, TM_TARGET, 16)
    tk, k_pad_chk = _tile_and_pad(c_in, TK_TARGET, 128)
    tn, n_pad_chk = _tile_and_pad(c_out, TN_TARGET, 128)
    assert (k_pad, n_pad) == (k_pad_chk, n_pad_chk), "params not prepared for this input"

    # Input quantizers are enabled_by_default=False -> passthrough.  MXU
    # operand fed as bf16 (works on all generations; v7x MXU has no int path).
    # allow_input_fusion lets XLA fuse this pad/cast into the pallas_call
    # operand so the padded bf16 copy is not materialized in HBM.
    x2d = jnp.pad(x.reshape(m, c_in).astype(jnp.bfloat16),
                  ((0, m_pad - m), (0, k_pad - c_in)))

    gm, gn, gk = m_pad // tm, n_pad // tn, k_pad // tk

    # --- pass 1: tiled matmul + fused bias + fused per-tile min/max ----------
    y_pad, tile_min, tile_max = pl.pallas_call(
        functools.partial(_matmul_bias_kernel,
                          m_valid=m, tile_m=tm, apply_row_mask=(m_pad != m)),
        out_shape=(
            jax.ShapeDtypeStruct((m_pad, n_pad), jnp.float32),
            jax.ShapeDtypeStruct((gm, gn), jnp.float32),
            jax.ShapeDtypeStruct((gm, gn), jnp.float32),
        ),
        grid=(gm, gn, gk),
        in_specs=[
            pl.BlockSpec((tm, tk), lambda i, j, k: (i, k)),
            pl.BlockSpec((tk, tn), lambda i, j, k: (k, j)),
            pl.BlockSpec((1, tn), lambda i, j, k: (0, j)),
        ],
        out_specs=(
            pl.BlockSpec((tm, tn), lambda i, j, k: (i, j)),
            pl.BlockSpec((1, 1), lambda i, j, k: (i, j),
                         memory_space=pltpu.MemorySpace.SMEM),
            pl.BlockSpec((1, 1), lambda i, j, k: (i, j),
                         memory_space=pltpu.MemorySpace.SMEM),
        ),
        scratch_shapes=[pltpu.VMEM((tm, tn), jnp.float32)],
        compiler_params=pltpu.CompilerParams(
            dimension_semantics=("parallel", "parallel", "arbitrary"),
            vmem_limit_bytes=VMEM_LIMIT_BYTES,
            allow_input_fusion=[True, False, False]),
    )(x2d, w_prep, b_prep)

    # --- output quantizer: global per-tensor encoding (tiny XLA reduction) ---
    inv_scale, scale, zero_point = _compute_encoding(
        jnp.min(tile_min), jnp.max(tile_max), ACT_BW)
    enc = jnp.stack([inv_scale, scale, zero_point]).astype(jnp.float32)

    # --- pass 2: lane-dense elementwise quantize-dequantize ------------------
    # Writes the UNPADDED (m, c_out) output directly (ragged edge blocks are
    # masked), so no post-kernel slice copy is needed.
    tm2, tn2 = _pass2_tiles(m_pad, n_pad, tm, tn)
    out2d = pl.pallas_call(
        functools.partial(_output_fakequant_kernel, num_steps=ACT_NUM_STEPS),
        out_shape=jax.ShapeDtypeStruct((m, c_out), jnp.float32),
        grid=(m_pad // tm2, n_pad // tn2),
        in_specs=[
            pl.BlockSpec(memory_space=pltpu.MemorySpace.SMEM),   # encoding scalars
            pl.BlockSpec((tm2, tn2), lambda i, j: (i, j)),
        ],
        out_specs=pl.BlockSpec((tm2, tn2), lambda i, j: (i, j)),
        compiler_params=pltpu.CompilerParams(
            dimension_semantics=("parallel", "parallel"),
            vmem_limit_bytes=VMEM_LIMIT_BYTES),
    )(enc, y_pad)

    return out2d.reshape(b, s, c_out)


# ----------------------------------------------------------------------------
# Pure-JAX reference (same semantics, same bf16 matmul operands)
# ----------------------------------------------------------------------------
def _reference_forward(x, weight, bias):
    b, s, c_in = x.shape
    c_out = weight.shape[0]
    w_dq = jnp.transpose(_fake_quant_static(weight.astype(jnp.float32),
                                            WEIGHT_BW)).astype(jnp.bfloat16)
    b_dq = _fake_quant_static(bias.astype(jnp.float32), WEIGHT_BW).reshape(1, c_out)
    x2d = x.reshape(b * s, c_in).astype(jnp.bfloat16)
    y = jnp.dot(x2d, w_dq, preferred_element_type=jnp.float32) + b_dq
    inv_s, sc, zp = _compute_encoding(jnp.min(y), jnp.max(y), ACT_BW)
    out = _apply_fake_quant(y, inv_s, sc, zp, ACT_NUM_STEPS)
    return out.reshape(b, s, c_out), sc


if __name__ == "__main__":
    key = jax.random.PRNGKey(0)
    k1, k2, k3 = jax.random.split(key, 3)

    # Small shapes consistent with wrapping nn.Linear(32, 32).  S=9 makes
    # M=18, exercising the M-padding / row-mask path (padded to 32 rows);
    # C_out=32 exercises lane padding to 128 and the ragged pass-2 output.
    B, S, C_in, C_out = 2, 9, 32, 32
    x = jax.random.normal(k1, (B, S, C_in), jnp.float32)
    weight = jax.random.normal(k2, (C_out, C_in), jnp.float32) * 0.1
    bias = jax.random.normal(k3, (C_out,), jnp.float32) * 0.1

    # One-time parameter prep (weights/bias are constant across forwards).
    w_prep, b_prep = prepare_qc_linear_params(weight, bias)

    y = qc_quantize_wrapper_forward(x, w_prep, b_prep, c_out=C_out)
    jax.block_until_ready(y)

    y_ref, step = _reference_forward(x, weight, bias)
    assert y.shape == (B, S, C_out) and y.dtype == jnp.float32
    # Outputs live on an 8-bit grid; allow at most one quantization step of
    # slack for accumulation-order ulp differences flipping a borderline bin.
    max_err = float(jnp.max(jnp.abs(y - y_ref)))
    assert max_err <= float(step) + 1e-5, f"mismatch vs reference: {max_err}"

    print("KERNEL_OK")
</pallas_src>

<mosaic_0001>
module attributes {stable_mosaic.version = 11 : i64} {
  func.func @_matmul_bias_kernel(%arg0: i32, %arg1: i32, %arg2: i32, %arg3: memref<32x128xbf16, #tpu.memory_space<vmem>>, %arg4: memref<128x128xbf16, #tpu.memory_space<vmem>>, %arg5: memref<1x128xf32, #tpu.memory_space<vmem>>, %arg6: memref<32x128xf32, #tpu.memory_space<vmem>>, %arg7: memref<1x1xf32, #tpu.memory_space<smem>>, %arg8: memref<1x1xf32, #tpu.memory_space<smem>>, %arg9: memref<32x128xf32, #tpu.memory_space<vmem>>) attributes {dimension_semantics = [#tpu.dimension_semantics<parallel>, #tpu.dimension_semantics<parallel>, #tpu.dimension_semantics<arbitrary>], iteration_bounds = array<i64: 1, 1, 1>, scalar_prefetch = 0 : i64, scratch_operands = 1 : i64, tpu.core_type = #tpu.core_type<tc>, window_params = [{transform_indices = @transform_0, window_bounds = array<i64: 32, 128>}, {transform_indices = @transform_1, window_bounds = array<i64: 128, 128>}, {transform_indices = @transform_2, window_bounds = array<i64: 1, 128>}, {transform_indices = @transform_3, window_bounds = array<i64: 32, 128>}, {transform_indices = @transform_4, window_bounds = array<i64: 1, 1>}, {transform_indices = @transform_5, window_bounds = array<i64: 1, 1>}]} {
    %c32_i32 = arith.constant 32 : i32
    %0 = arith.muli %arg0, %c32_i32 : i32
    %c0_i32 = arith.constant 0 : i32
    %1 = arith.cmpi eq, %arg2, %c0_i32 : i32
    %2 = arith.extui %1 : i1 to i32
    %c0_i32_0 = arith.constant 0 : i32
    %3 = arith.cmpi ne, %2, %c0_i32_0 : i32
    scf.if %3 {
      %c0_10 = arith.constant 0 : index
      %c0_11 = arith.constant 0 : index
      %13 = vector.load %arg5[%c0_10, %c0_11] : memref<1x128xf32, #tpu.memory_space<vmem>>, vector<1x128xf32>
      %14 = vector.shape_cast %13 : vector<1x128xf32> to vector<1x128xf32>
      %15 = vector.broadcast %14 : vector<1x128xf32> to vector<32x128xf32>
      %c0_12 = arith.constant 0 : index
      %c0_13 = arith.constant 0 : index
      %16 = vector.load %arg9[%c0_12, %c0_13] : memref<32x128xf32, #tpu.memory_space<vmem>>, vector<32x128xf32>
      tpu.vector_store %arg9[%c0_12, %c0_13], %15 {strides = array<i32>} : memref<32x128xf32, #tpu.memory_space<vmem>>, vector<32x128xf32>,
    } else {
    }
    %c0 = arith.constant 0 : index
    %c0_1 = arith.constant 0 : index
    %4 = vector.load %arg9[%c0, %c0_1] : memref<32x128xf32, #tpu.memory_space<vmem>>, vector<32x128xf32>
    %c0_2 = arith.constant 0 : index
    %c0_3 = arith.constant 0 : index
    %5 = vector.load %arg3[%c0_2, %c0_3] : memref<32x128xbf16, #tpu.memory_space<vmem>>, vector<32x128xbf16>
    %c0_4 = arith.constant 0 : index
    %c0_5 = arith.constant 0 : index
    %6 = vector.load %arg4[%c0_4, %c0_5] : memref<128x128xbf16, #tpu.memory_space<vmem>>, vector<128x128xbf16>
    %cst = arith.constant dense<0.000000e+00> : vector<32x128xf32>
    %7 = tpu.matmul %5, %6, %cst {dimension_numbers = #tpu.dot_dimension_numbers<[1], [0], [0], [1], [0, 0, 1, 1], [], []>} : vector<32x128xbf16>, vector<128x128xbf16>, vector<32x128xf32> -> vector<32x128xf32>
    %8 = arith.addf %4, %7 : vector<32x128xf32>
    %c0_6 = arith.constant 0 : index
    %c0_7 = arith.constant 0 : index
    %9 = vector.load %arg9[%c0_6, %c0_7] : memref<32x128xf32, #tpu.memory_space<vmem>>, vector<32x128xf32>
    tpu.vector_store %arg9[%c0_6, %c0_7], %8 {strides = array<i32>} : memref<32x128xf32, #tpu.memory_space<vmem>>, vector<32x128xf32>,
    %c0_i32_8 = arith.constant 0 : i32
    %10 = arith.cmpi eq, %arg2, %c0_i32_8 : i32
    %11 = arith.extui %10 : i1 to i32
    %c0_i32_9 = arith.constant 0 : i32
    %12 = arith.cmpi ne, %11, %c0_i32_9 : i32
    scf.if %12 {
      %c0_10 = arith.constant 0 : index
      %c0_11 = arith.constant 0 : index
      %13 = vector.load %arg9[%c0_10, %c0_11] : memref<32x128xf32, #tpu.memory_space<vmem>>, vector<32x128xf32>
      %14 = tpu.iota {dimensions = array<i32: 0>} : vector<32x128xi32>
      %15 = vector.broadcast %0 : i32 to vector<32x128xi32>
      %16 = arith.addi %15, %14 : vector<32x128xi32>
      %c18_i32 = arith.constant 18 : i32
      %17 = vector.broadcast %c18_i32 : i32 to vector<32x128xi32>
      %18 = arith.cmpi slt, %16, %17 : vector<32x128xi32>
      %cst_12 = arith.constant 0.000000e+00 : f32
      %19 = vector.broadcast %cst_12 : f32 to vector<32x128xf32>
      %20 = arith.select %18, %13, %19 : vector<32x128xi1>, vector<32x128xf32>
      %c0_13 = arith.constant 0 : index
      %c0_14 = arith.constant 0 : index
      %21 = vector.load %arg6[%c0_13, %c0_14] : memref<32x128xf32, #tpu.memory_space<vmem>>, vector<32x128xf32>
      tpu.vector_store %arg6[%c0_13, %c0_14], %20 {strides = array<i32>} : memref<32x128xf32, #tpu.memory_space<vmem>>, vector<32x128xf32>,
      %22 = vector.shape_cast %20 : vector<32x128xf32> to vector<1x32x128xf32>
      %cst_15 = arith.constant dense<0x7F800000> : vector<1xf32>
      %23 = vector.multi_reduction <minimumf>, %22, %cst_15 [1, 2] : vector<1x32x128xf32> to vector<1xf32>
      %24 = vector.shape_cast %23 : vector<1xf32> to vector<1x1x1xf32>
      %25 = vector.extract %24[0, 0, 0] : f32 from vector<1x1x1xf32>
      %c0_16 = arith.constant 0 : index
      %c0_17 = arith.constant 0 : index
      %26 = memref.load %arg7[%c0_16, %c0_17] : memref<1x1xf32, #tpu.memory_space<smem>>
      memref.store %25, %arg7[%c0_16, %c0_17] : memref<1x1xf32, #tpu.memory_space<smem>>
      %27 = vector.shape_cast %20 : vector<32x128xf32> to vector<1x32x128xf32>
      %cst_18 = arith.constant dense<0xFF800000> : vector<1xf32>
      %28 = vector.multi_reduction <maximumf>, %27, %cst_18 [1, 2] : vector<1x32x128xf32> to vector<1xf32>
      %29 = vector.shape_cast %28 : vector<1xf32> to vector<1x1x1xf32>
      %30 = vector.extract %29[0, 0, 0] : f32 from vector<1x1x1xf32>
      %c0_19 = arith.constant 0 : index
      %c0_20 = arith.constant 0 : index
      %31 = memref.load %arg8[%c0_19, %c0_20] : memref<1x1xf32, #tpu.memory_space<smem>>
      memref.store %30, %arg8[%c0_19, %c0_20] : memref<1x1xf32, #tpu.memory_space<smem>>
    } else {
    }
    return
  }
  func.func @transform_0(%arg0: i32, %arg1: i32, %arg2: i32) -> (i32, i32) {
    %c0_i32 = arith.constant 0 : i32
    return %arg0, %arg2 : i32, i32
  }
  func.func @transform_1(%arg0: i32, %arg1: i32, %arg2: i32) -> (i32, i32) {
    %c0_i32 = arith.constant 0 : i32
    return %arg2, %arg1 : i32, i32
  }
  func.func @transform_2(%arg0: i32, %arg1: i32, %arg2: i32) -> (i32, i32) {
    %c0_i32 = arith.constant 0 : i32
    %c0_i32_0 = arith.constant 0 : i32
    return %c0_i32, %arg1 : i32, i32
  }
  func.func @transform_3(%arg0: i32, %arg1: i32, %arg2: i32) -> (i32, i32) {
    %c0_i32 = arith.constant 0 : i32
    return %arg0, %arg1 : i32, i32
  }
  func.func @transform_4(%arg0: i32, %arg1: i32, %arg2: i32) -> (i32, i32) {
    %c0_i32 = arith.constant 0 : i32
    return %arg0, %arg1 : i32, i32
  }
  func.func @transform_5(%arg0: i32, %arg1: i32, %arg2: i32) -> (i32, i32) {
    %c0_i32 = arith.constant 0 : i32
    return %arg0, %arg1 : i32, i32
  }
}

module attributes {stable_mosaic.version = 11 : i64} {
  func.func @_output_fakequant_kernel(%arg0: i32, %arg1: i32, %arg2: memref<3xf32, #tpu.memory_space<smem>>, %arg3: memref<32x128xf32, #tpu.memory_space<vmem>>, %arg4: memref<32x128xf32, #tpu.memory_space<vmem>>) attributes {dimension_semantics = [#tpu.dimension_semantics<parallel>, #tpu.dimension_semantics<parallel>], iteration_bounds = array<i64: 1, 1>, scalar_prefetch = 0 : i64, scratch_operands = 0 : i64, tpu.core_type = #tpu.core_type<tc>, window_params = [{transform_indices = @transform_0, window_bounds = array<i64: 3>}, {transform_indices = @transform_1, window_bounds = array<i64: 32, 128>}, {transform_indices = @transform_2, window_bounds = array<i64: 32, 128>}]} {
    %c0 = arith.constant 0 : index
    %0 = memref.load %arg2[%c0] : memref<3xf32, #tpu.memory_space<smem>>
    %c1 = arith.constant 1 : index
    %1 = memref.load %arg2[%c1] : memref<3xf32, #tpu.memory_space<smem>>
    %c2 = arith.constant 2 : index
    %2 = memref.load %arg2[%c2] : memref<3xf32, #tpu.memory_space<smem>>
    %c0_0 = arith.constant 0 : index
    %c0_1 = arith.constant 0 : index
    %3 = vector.load %arg3[%c0_0, %c0_1] : memref<32x128xf32, #tpu.memory_space<vmem>>, vector<32x128xf32>
    %4 = vector.broadcast %0 : f32 to vector<32x128xf32>
    %5 = arith.mulf %3, %4 : vector<32x128xf32>
    %cst = arith.constant 0.000000e+00 : f32
    %6 = vector.broadcast %cst : f32 to vector<32x128xf32>
    %7 = arith.cmpf oge, %5, %6 : vector<32x128xf32>
    %cst_2 = arith.constant 5.000000e-01 : f32
    %8 = vector.broadcast %cst_2 : f32 to vector<32x128xf32>
    %9 = arith.addf %5, %8 : vector<32x128xf32>
    %10 = math.floor %9 : vector<32x128xf32>
    %cst_3 = arith.constant 5.000000e-01 : f32
    %11 = vector.broadcast %cst_3 : f32 to vector<32x128xf32>
    %12 = arith.subf %5, %11 : vector<32x128xf32>
    %13 = math.ceil %12 : vector<32x128xf32>
    %14 = arith.select %7, %10, %13 : vector<32x128xi1>, vector<32x128xf32>
    %15 = vector.broadcast %2 : f32 to vector<32x128xf32>
    %16 = arith.addf %14, %15 : vector<32x128xf32>
    %cst_4 = arith.constant 0.000000e+00 : f32
    %cst_5 = arith.constant 2.550000e+02 : f32
    %17 = vector.broadcast %cst_4 : f32 to vector<32x128xf32>
    %18 = arith.maximumf %17, %16 : vector<32x128xf32>
    %19 = vector.broadcast %cst_5 : f32 to vector<32x128xf32>
    %20 = arith.minimumf %19, %18 : vector<32x128xf32>
    %21 = vector.broadcast %2 : f32 to vector<32x128xf32>
    %22 = arith.subf %20, %21 : vector<32x128xf32>
    %23 = vector.broadcast %1 : f32 to vector<32x128xf32>
    %24 = arith.mulf %22, %23 : vector<32x128xf32>
    %c0_6 = arith.constant 0 : index
    %c0_7 = arith.constant 0 : index
    %25 = vector.load %arg4[%c0_6, %c0_7] : memref<32x128xf32, #tpu.memory_space<vmem>>, vector<32x128xf32>
    tpu.vector_store %arg4[%c0_6, %c0_7], %24 {strides = array<i32>} : memref<32x128xf32, #tpu.memory_space<vmem>>, vector<32x128xf32>,
    return
  }
  func.func @transform_0(%arg0: i32, %arg1: i32) -> i32 {
    %c0_i32 = arith.constant 0 : i32
    %c0_i32_0 = arith.constant 0 : i32
    return %c0_i32 : i32
  }
  func.func @transform_1(%arg0: i32, %arg1: i32) -> (i32, i32) {
    %c0_i32 = arith.constant 0 : i32
    return %arg0, %arg1 : i32, i32
  }
  func.func @transform_2(%arg0: i32, %arg1: i32) -> (i32, i32) {
    %c0_i32 = arith.constant 0 : i32
    return %arg0, %arg1 : i32, i32
  }
}

</mosaic_0001>

<bundles_post_ra>
// kernel: qc_quantize_wrapper_forward.3
= control target key start
LH: loop header
LB: loop body
LE: loop exit
PB: predicated region body
PF: predicated region fallthrough
CT: control target
= control target key end

     0   :  { %7 = vsyncpa [#allocation3], 0  ;;  %s193_s0 = inlined_call_operand.vmem [shape: f32[3], index: 0, kind: input, shape index: {}]   ;;  %s194_s1 = inlined_call_operand.vmem [shape: f32[32,128], index: 1, kind: input, shape index: {}]   ;;  %s195_s2 = inlined_call_operand.vmem [shape: f32[18,32], index: 2, kind: output, shape index: {}]  }
   0x1   :  { %s14_s11 = sshll.u32 %s193_s0, 4  ;;  %s15_s11 = int_to_ptr.vmem [resolvable:$true] %s14_s11 }
   0x2   :  { %s142_s12 = scalar_lea.vmem %s15_s11, 16  ;;  %p147_p1 = scmp.lt.s32.totalorder %s15_s11, %s15_s11 }
   0x3   :  { %p143_p0 = scmp.ne.s32.totalorder %s15_s11, %s142_s12  ;;  %p148_p2 = scmp.lt.s32.totalorder %s142_s12, %s142_s12 }
   0x5   :  { %p149_p3 = por %p148_p2, %p147_p1 }
   0x7   :  { %p150_p4 = pnand %p149_p3, %p143_p0 }
   0x9   :  { %153 = shalt.err (!%p150_p4)
}
   0xa   :  { %s156_s13 = smov [#allocation2]  }
   0xb   :  { %17 = dma.vmem_to_smem %s15_s11, 16, %s156_s13, [#allocation3]  }
   0xc   :  { %154 = dma.done.wait [#allocation3], 16  }
   0xd   :  { %155 = vsyncadd [#allocation3], 4294967280 }
   0xe   :  { %23 = sfence }
   0xf   :  { %s24_s14 = sld [smem:[#allocation2]]  ;;  %s136_s15 = sld [smem:[#allocation2 + $0x2]]  ;;  %v27_v0 = vld [vmem:[%s194_s1] sm:$0xff]  ;;  %v28_v1 = vld [vmem:[%s194_s1 + $0x8] sm:$0xff]  ;;  %v29_v2 = vld [vmem:[%s194_s1 + $0x10] sm:$0xff] }
  0x10   :  { %s135_s21 = sld [smem:[#allocation2 + $0x1]] }
  0x15   :  { %v31_v3 = vstv %s24_s14  ;;  %v60_v9 = vstv %s136_s15 }
  0x16   :  { %v32_v4 = vmul.f32 %v31_v3, %v27_v0  ;;  %v33_v5 = vmul.f32 %v31_v3, %v28_v1  ;;  %v34_v6 = vmul.f32 %v31_v3, %v29_v2  ;;  %v77_v30 = vstv %s135_s21 }
  0x18   :  { %v40_v7 = vadd.f32 0.5, %v32_v4  ;;  %v137_v8 = vadd.f32 -0.5, %v32_v4  ;;  %vm36_vm0 = vcmp.ge.f32.partialorder %v32_v4, 0.0  ;;  %v41_v10 = vadd.f32 0.5, %v33_v5 }
  0x19   :  { %v138_v11 = vadd.f32 -0.5, %v33_v5  ;;  %v42_v12 = vadd.f32 0.5, %v34_v6  ;;  %vm37_vm1 = vcmp.ge.f32.partialorder %v33_v5, 0.0  ;;  %v139_v15 = vadd.f32 -0.5, %v34_v6 }
  0x1a   :  { %v44_v13 = vfloor.f32 %v40_v7  ;;  %v52_v14 = vceil.f32 %v137_v8  ;;  %v45_v16 = vfloor.f32 %v41_v10  ;;  %vm38_vm2 = vcmp.ge.f32.partialorder %v34_v6, 0.0 }
  0x1b   :  { %v53_v17 = vceil.f32 %v138_v11  ;;  %v46_v18 = vfloor.f32 %v42_v12  ;;  %v54_v20 = vceil.f32 %v139_v15 }
  0x1c   :  { %v56_v19 = vsel %vm36_vm0, %v44_v13, %v52_v14 }
  0x1d   :  { %v61_v21 = vadd.f32 %v60_v9, %v56_v19  ;;  %v57_v22 = vsel %vm37_vm1, %v45_v16, %v53_v17  ;;  %v58_v24 = vsel %vm38_vm2, %v46_v18, %v54_v20 }
  0x1e   :  { %v62_v23 = vadd.f32 %v60_v9, %v57_v22  ;;  %v63_v26 = vadd.f32 %v60_v9, %v58_v24 }
  0x1f   :  { %v65_v25 = vmax.f32 %v61_v21, 0.0 }
  0x20   :  { %v66_v27 = vmax.f32 %v62_v23, 0.0  ;;  %v67_v29 = vmax.f32 %v63_v26, 0.0 }
  0x21   :  { %v69_v28 = vmin.f32 %v65_v25, 255.0 }
  0x22   :  { %v70_v31 = vmin.f32 %v66_v27, 255.0  ;;  %v71_v33 = vmin.f32 %v67_v29, 255.0 }
  0x23   :  { %v73_v32 = vsub.f32 %v69_v28, %v60_v9 }
  0x24   :  { %v74_v34 = vsub.f32 %v70_v31, %v60_v9  ;;  %v75_v36 = vsub.f32 %v71_v33, %v60_v9 }
  0x25   :  { %v78_v35 = vmul.f32 %v77_v30, %v73_v32 }
  0x26   :  { %v79_v37 = vmul.f32 %v77_v30, %v74_v34  ;;  %v80_v38 = vmul.f32 %v77_v30, %v75_v36 }
  0x27   :  { %120 = vst [vmem:[%s195_s2] sm:$0xff] %v78_v35 }
  0x28   :  { %122 = vst [vmem:[%s195_s2 + $0x8] sm:$0xff] %v79_v37  ;;  %124 = vst [vmem:[%s195_s2 + $0x10] sm:$0xff] %v80_v38 }
  0x29   :  { %130 = vsyncpa [#allocation3], 1 }

// kernel: qc_quantize_wrapper_forward.4
= control target key start
LH: loop header
LB: loop body
LE: loop exit
PB: predicated region body
PF: predicated region fallthrough
CT: control target
= control target key end

     0   :  { %s553_s0 = inlined_call_operand.vmem [shape: bf16[128,128], index: 0, kind: input, shape index: {}]   ;;  %s554_s1 = inlined_call_operand.vmem [shape: f32[1,128], index: 1, kind: input, shape index: {}]   ;;  %s555_s2 = inlined_call_operand.vmem [shape: bf16[18,32], index: 2, kind: input, shape index: {}]   ;;  %s556_s3 = inlined_call_operand.<no memory space> [shape: bf16[], index: 3, kind: input, shape index: {}]   ;;  %s557_s4 = inlined_call_operand.vmem [shape: f32[32,128], index: 4, kind: output, shape index: {0}]   ;;  %s558_s5 = inlined_call_operand.hbm [shape: f32[1,1], index: 5, kind: output, shape index: {1}]   ;;  %s559_s6 = inlined_call_operand.hbm [shape: f32[1,1], index: 6, kind: output, shape index: {2}]  }
   0x1   :  { %v12_v0 = vstv %s556_s3 }
   0x2   :  { %v13_v1 = vunpack.i.l.bf16 %v12_v0 }
   0x3   :  { %17 = vsyncpa [#allocation9], 0  ;;  %v407_v2 = vld [vmem:[%s553_s0] sm:$0xff]   ;;  %v42_v3 = vlaneseq  ;;  %v408_v4 = vld [vmem:[%s553_s0 + $0x8] sm:$0xff]   ;;  %v441_v5 = vmov 0.0  }
   0x4   :  { %294 = vst [vmem:[%s557_s4 + $0x18] sm:$0xff] %v441_v5  ;;  %380 = vmatprep.subr.bf16.mxu0 %v407_v2  ;;  %v409_v7 = vld [vmem:[%s553_s0 + $0x10] sm:$0xff]   ;;  %v410_v10 = vld [vmem:[%s553_s0 + $0x18] sm:$0xff]   ;;  %v34_v11 = vld [vmem:[%s555_s2] sm:$0xff]  }
   0x5   :  { %381 = vmatpush3.bf16.msra.mxu0 %v407_v2  ;;  %v91_v6 = vshrl.u32 %v42_v3, 7  ;;  %v43_v8 = vand.u32 127, %v42_v3  ;;  %v353_v12 = vld [vmem:[%s555_s2 + $0x8] sm:$0xf]  ;;  %v35_v13 = vunpack.c.l.bf16 %v34_v11  ;;  %v61_v14 = vunpack.c.h.bf16 %v34_v11 }
   0x6   :  { %382 = vmatprep.subr.bf16.mxu0 %v408_v4  ;;  %v88_v15 = vunpack.c.l.bf16 %v353_v12 }
   0x7   :  { %v92_v9 = vadd.s32 16, %v91_v6  ;;  %vm45_vm0 = vcmp.lt.s32.totalorder %v43_v8, 32 }
   0x9   :  { %383 = vmatpush3.bf16.msra.mxu0 %v408_v4  ;;  %vm93_vm1 = vcmp.lt.s32.totalorder %v92_v9, 18 }
   0xa   :  { %384 = vmatprep.subr.bf16.mxu0 %v409_v7 }
   0xb   :  { %18 = vsyncpa [#allocation11], 0  ;;  %v46_v16 = vsel %vm45_vm0, %v35_v13, %v13_v1  ;;  %v72_v17 = vsel %vm45_vm0, %v61_v14, %v13_v1  ;;  %v94_v18 = vsel %vm93_vm1, %v88_v15, %v13_v1  ;;  %v411_v19 = vld [vmem:[%s553_s0 + $0x20] sm:$0xff]   ;;  %v412_v24 = vld [vmem:[%s553_s0 + $0x28] sm:$0xff]   ;;  %s417_s27 = scalar_lea.hbm %s558_s5, 16 }
   0xc   :  { %v47_v20 = vpack.c.bf16 %v441_v5, %v46_v16  ;;  %v74_v21 = vpack.c.bf16 %v441_v5, %v72_v17  ;;  %v99_v22 = vsel %vm45_vm0, %v94_v18, %v13_v1  ;;  %v413_v25 = vld [vmem:[%s553_s0 + $0x30] sm:$0xff]   ;;  %v414_v27 = vld [vmem:[%s553_s0 + $0x38] sm:$0xff]   ;;  %v354_v29 = vld [vmem:[%s554_s1] ss:$0 sm:$0xff]  ;;  %p418_p0 = scmp.ne.s32.totalorder %s558_s5, %s417_s27  ;;  %p421_p1 = scmp.lt.u32.totalorder %s417_s27, %s558_s5 }
   0xd   :  { %385 = vmatpush3.bf16.msra.mxu0 %v409_v7  ;;  %v368_v23 = vpack.c.bf16 %v13_v1, %v99_v22 }
   0xe   :  { %386 = vmatprep.subr.bf16.mxu0 %v410_v10  ;;  %49 = vst [vmem:[#allocation12] sm:$0xf] %v47_v20  ;;  %76 = vst [vmem:[#allocation12 + $0x4] sm:$0xf] %v74_v21  ;;  %p423_p2 = pnand %p421_p1, %p418_p0 }
   0xf   :  { %369 = vst [vmem:[#allocation12 + $0x8] sm:$0xff] %v368_v23  }
  0x11   :  { %387 = vmatpush3.bf16.msra.mxu0 %v410_v10 }
  0x12   :  { %388 = vmatprep.subr.bf16.mxu0 %v411_v19 }
  0x15   :  { %389 = vmatpush3.bf16.msra.mxu0 %v411_v19  ;;  %v415_v26 = vld [vmem:[#allocation12] sm:$0xff]  }
  0x16   :  { %390 = vmatprep.subr.bf16.mxu0 %v412_v24  ;;  %396 = vmatprep.mubr.bf16.mxu0 %v415_v26  ;;  %v416_v28 = vld [vmem:[#allocation12 + $0x8] sm:$0xff]  }
  0x19   :  { %391 = vmatpush3.bf16.msra.mxu0 %v412_v24 }
  0x1a   :  { %392 = vmatprep.subr.bf16.mxu0 %v413_v25 }
  0x1d   :  { %393 = vmatpush3.bf16.msra.mxu0 %v413_v25 }
  0x1e   :  { %394 = vmatprep.subr.bf16.mxu0 %v414_v27 }
  0x21   :  { %395 = vmatpush3.bf16.msra.mxu0 %v414_v27 }
  0x24   :  { %397 = vmatmul.mubr.bf16.vlgmr.msra.gmra.mrb[0].mxu0 %v416_v28 }
  0xf7   :  { %v398_v30 = vpop.f32.mrb[0].mxu0 }
  0xf8   :  { %v260_v31 = vadd.f32 %v398_v30, %v354_v29  ;;  %v243_v32 = vpop.f32.mrb[1].mxu0 }
  0xf9   :  { %v258_v33 = vadd.f32 %v354_v29, %v243_v32  ;;  %v399_v34 = vpop.f32.mrb[2].mxu0 }
  0xfa   :  { %v289_v35 = vsel %vm93_vm1, %v260_v31, 0.0  ;;  %v246_v36 = vpop.f32.mrb[3].mxu0 }
  0xfb   :  { %293 = vst [vmem:[%s557_s4 + $0x10] sm:$0xff] %v289_v35  ;;  %291 = vst [vmem:[%s557_s4] sm:$0xff] %v258_v33  ;;  %v259_v37 = vadd.f32 %v354_v29, %v246_v36  ;;  %v296_v39 = vmin.f32 %v289_v35, 0.0  ;;  %v310_v41 = vmax.f32 %v289_v35, 0.0 }
  0xfd   :  { %292 = vst [vmem:[%s557_s4 + $0x8] sm:$0xff] %v259_v37  ;;  %v295_v38 = vmin.f32 %v258_v33, %v259_v37  ;;  %v309_v40 = vmax.f32 %v258_v33, %v259_v37 }
  0xff   :  { %v297_v42 = vmin.f32 %v295_v38, %v296_v39  ;;  %v311_v43 = vmax.f32 %v309_v40, %v310_v41 }
 0x101   :  { %298 = vmin.xlane.f32.xlu0 %v297_v42 }
 0x105   :  { %312 = vmax.xlane.f32.xlu0 %v311_v43 }
 0x18e   :  { %v299_v44 = vpop.xlane.xlu0 %298 }
 0x18f   :  { %v300_v45 = vrot.slane %v299_v44, 4 }
 0x191   :  { %v301_v46 = vmin.f32 %v299_v44, %v300_v45 }
 0x192   :  { %v313_v47 = vpop.xlane.xlu0 %312 }
 0x193   :  { %v302_v48 = vrot.slane %v301_v46, 2  ;;  %v314_v49 = vrot.slane %v313_v47, 4 }
 0x195   :  { %v315_v50 = vmax.f32 %v313_v47, %v314_v49  ;;  %v303_v51 = vmin.f32 %v301_v46, %v302_v48 }
 0x197   :  { %v316_v52 = vrot.slane %v315_v50, 2  ;;  %v304_v53 = vrot.slane %v303_v51, 1 }
 0x199   :  { %v317_v54 = vmax.f32 %v315_v50, %v316_v52  ;;  %v305_v55 = vmin.f32 %v303_v51, %v304_v53 }
 0x19b   :  { %400 = vpush %v305_v55  ;;  %v318_v56 = vrot.slane %v317_v54, 1 }
 0x19d   :  { %v319_v57 = vmax.f32 %v317_v54, %v318_v56 }
 0x19f   :  { %402 = vpush %v319_v57 }
 0x1cc   :  { %s401_s1 = spop %400 }
 0x1cd   :  { %308 = sst [smem:[#allocation8]] %s401_s1 }
 0x1ce   :  { %426 = shalt.err (!%p423_p2)
}
 0x1cf   :  { %s442_s7 = smov [#allocation8]   ;;  %s427_s13 = scalar_lea.hbm %s559_s6, 16 }
 0x1d0   :  { %332 = dma.smem_to_hbm %s442_s7, 16, %s558_s5, [#allocation9]  }
 0x1d1   :  { %s403_s10 = spop %402  ;;  %p428_p3 = scmp.ne.s32.totalorder %s559_s6, %s427_s13 }
 0x1d2   :  { %322 = sst [smem:[#allocation10]] %s403_s10  ;;  %p431_p4 = scmp.lt.u32.totalorder %s427_s13, %s559_s6 }
 0x1d4   :  { %p433_p5 = pnand %p431_p4, %p428_p3 }
 0x1d6   :  { %436 = shalt.err (!%p433_p5)
}
 0x1d7   :  { %s443_s17 = smov [#allocation10]  }
 0x1d8   :  { %340 = dma.smem_to_hbm %s443_s17, 16, %s559_s6, [#allocation11]  }
 0x1d9   :  { %437 = dma.done.wait [#allocation9], 16  }
 0x1da   :  { %438 = vsyncadd [#allocation9], 4294967280 }
 0x1db   :  { %439 = dma.done.wait [#allocation11], 16  }
 0x1dc   :  { %440 = vsyncadd [#allocation11], 4294967280 }
 0x1dd   :  { %349 = sfence }
 0x1de   :  { %350 = vsyncpa [#allocation9], 1 }
 0x1df   :  { %351 = vsyncpa [#allocation11], 1 }

</bundles_post_ra>
